<compile_context>
chip_gen: v7x
topology: tpu7x:2x2x1
jax: 0.10.0
libtpu: 0.0.40
codegen_flags: <defaults>
</compile_context>

<pallas_src>
import numpy as np
import jax
import jax.numpy as jnp
from jax.experimental import pallas as pl
from jax.experimental.pallas import tpu as pltpu

_EPS = 1e-12  # L2Pool2d.EPS


# ----------------------------- Pallas kernel -----------------------------

def _l2pool_kernel(x_ref, m_ref, mask_ref, o_ref):
    # x_ref   : (Gb*H, W)   Gb stacked channel planes (NCHW-native rows)
    # m_ref   : (W, Wo)     horizontal [1,2,1] taps * stride-2 decimation / 16
    # mask_ref: (Gb*Ho, 1)  0.0 on the first output row of each plane, else 1.0
    # o_ref   : (Gb*Ho, Wo)
    rows = o_ref.shape[0]                       # Gb * Ho

    # Vertical [1,2,1] pass fused with the stride-2 row decimation: two
    # sublane-strided loads (even rows = centre taps, odd rows = bottom taps);
    # squares recomputed per tap on the VPU (cheap, removes scratch writeback).
    x_even = x_ref[pl.ds(0, rows, 2), :].astype(jnp.float32)
    x_odd = x_ref[pl.ds(1, rows, 2), :].astype(jnp.float32)
    sq_even = x_even * x_even
    sq_odd = x_odd * x_odd

    # Top tap of output row r is the bottom tap of output row r-1; the first
    # output row of every plane has a zero top tap (padding=1).  Shift the
    # already-squared odd rows down by one row and mask the plane boundaries.
    sq_top = jnp.concatenate(
        [jnp.zeros_like(sq_odd[:1, :]), sq_odd[:-1, :]], axis=0)
    sq_top = sq_top * mask_ref[...]

    v = sq_top + 2.0 * sq_even + sq_odd          # (Gb*Ho, W) vertical Hann pass

    # Horizontal [1,2,1] pass + stride-2 column decimation + 1/16 normalisation
    # as one banded matmul on the idle MXU (no lane-strided loads, Wo is
    # lane-dense in the output).
    acc = jnp.dot(v, m_ref[...],
                  preferred_element_type=jnp.float32,
                  precision=jax.lax.Precision.HIGHEST)

    o_ref[...] = jnp.sqrt(acc + _EPS).astype(o_ref.dtype)


# ----------------------------- wrapper helpers -----------------------------

def _hann_decim_matrix(W, Wo):
    """(W, Wo) matrix whose columns are the [1,2,1]/16 horizontal Hann taps at
    the stride-2 output positions (padding=1 -> out col wo uses in cols
    2*wo-1, 2*wo, 2*wo+1)."""
    m = np.zeros((W, Wo), np.float32)
    for wo in range(Wo):
        c = 2 * wo
        m[c, wo] = 2.0
        if c - 1 >= 0:
            m[c - 1, wo] = 1.0
        if c + 1 < W:
            m[c + 1, wo] = 1.0
    return jnp.asarray(m / 16.0)


def _pick_group(nc, h, w, ho, itemsize):
    """Channel planes per grid step: a divisor of nc whose block is
    sublane-aligned, stays well under every generation's scoped-VMEM default,
    and leaves >= 2 grid steps whenever possible (keeps both v7x TCs busy and
    the input DMA double-buffered)."""
    budget = 2 << 20                              # ~2 MiB input block
    cands = [g for g in range(1, nc + 1)
             if nc % g == 0 and (g == nc or (g * ho) % 8 == 0)]
    fit = [g for g in cands if g * h * w * itemsize <= budget]
    multi = [g for g in fit if nc // g >= 2]
    if multi:
        return max(multi)
    if fit:
        return max(fit)
    return min(cands)


# ----------------------------- wrapper -----------------------------

def l2pool2d(x, kernel_size=3, stride=2, padding=1):
    """L2 pooling with a 3x3 Hann window; NCHW in / NCHW out, dtype preserved."""
    if kernel_size != 3 or stride != 2 or padding != 1:
        raise NotImplementedError("only the module defaults (3, 2, 1) are supported")
    N, C, H, W = x.shape
    if H % 2 or W % 2:
        # TODO(synk): odd spatial sizes need one extra padded boundary row/col.
        raise NotImplementedError("even H and W only")
    Ho, Wo = H // 2, W // 2
    NC = N * C
    itemsize = jnp.dtype(x.dtype).itemsize

    Gb = _pick_group(NC, H, W, Ho, itemsize)
    grid = (NC // Gb,)

    m = _hann_decim_matrix(W, Wo)                           # (W, Wo) f32
    top_mask = np.ones((Gb * Ho, 1), np.float32)
    top_mask[0::Ho, 0] = 0.0                                # first row of each plane
    top_mask = jnp.asarray(top_mask)

    x_rows = x.reshape(NC * H, W)                           # free reshape (NCHW rows)

    # VMEM: double-buffered blocks + f32 temporaries.  Only raise the scoped
    # limit above the v5e 16 MiB default when needed, never past ~48 MiB
    # (safely below v7x's 64 MiB physical VMEM).
    need = (2 * Gb * H * W * itemsize + 2 * Gb * Ho * Wo * itemsize
            + 2 * (W * Wo + Gb * Ho) * 4 + 6 * Gb * Ho * W * 4 + (1 << 20))
    cp_kwargs = dict(dimension_semantics=("parallel",))
    if need > 16 * 1024 * 1024:
        # TODO(synk): if a single plane ever needs > ~48 MiB, add H-row tiling
        # with a 1-row halo instead of raising the limit further.
        cp_kwargs["vmem_limit_bytes"] = int(min(need, 48 * 1024 * 1024))

    cost = pl.CostEstimate(
        flops=int(NC * Ho * W * (2 * Wo + 6)),
        transcendentals=int(NC * Ho * Wo),
        bytes_accessed=int((NC * H * W + NC * Ho * Wo) * itemsize + W * Wo * 4),
    )

    y = pl.pallas_call(
        _l2pool_kernel,
        out_shape=jax.ShapeDtypeStruct((NC * Ho, Wo), x.dtype),
        grid=grid,
        in_specs=[
            pl.BlockSpec((Gb * H, W), lambda i: (i, 0)),    # Gb channel planes
            pl.BlockSpec((W, Wo), lambda i: (0, 0)),        # shared Hann matrix
            pl.BlockSpec((Gb * Ho, 1), lambda i: (0, 0)),   # plane-boundary mask
        ],
        out_specs=pl.BlockSpec((Gb * Ho, Wo), lambda i: (i, 0)),
        compiler_params=pltpu.CompilerParams(**cp_kwargs),
        cost_estimate=cost,
    )(x_rows, m, top_mask)

    return y.reshape(N, C, Ho, Wo)


# ----------------------------- reference (XLA) -----------------------------

def _l2pool_ref(x_nchw):
    # same kernel as torch.hann_window(5, periodic=False)[1:-1] outer / sum
    k = jnp.array([[1., 2., 1.], [2., 4., 2.], [1., 2., 1.]], jnp.float32) / 16.0
    C = x_nchw.shape[1]
    kern = jnp.tile(k[None, None, :, :], (C, 1, 1, 1))        # (C,1,3,3) depthwise
    out = jax.lax.conv_general_dilated(
        x_nchw * x_nchw, kern,
        window_strides=(2, 2), padding=((1, 1), (1, 1)),
        feature_group_count=C,
        dimension_numbers=("NCHW", "OIHW", "NCHW"))
    return jnp.sqrt(out + _EPS)


# ----------------------------------- main -----------------------------------

if __name__ == "__main__":
    key = jax.random.PRNGKey(0)
    N, C, H, W = 2, 4, 16, 16
    x = jax.random.uniform(key, (N, C, H, W), jnp.float32)

    fwd = jax.jit(l2pool2d)
    out = jax.block_until_ready(fwd(x))

    assert out.shape == (N, C, H // 2, W // 2), out.shape
    assert bool(jnp.all(jnp.isfinite(out)))

    ref = jax.block_until_ready(_l2pool_ref(x))
    np.testing.assert_allclose(np.asarray(out), np.asarray(ref),
                               rtol=1e-4, atol=1e-5)
    print("KERNEL_OK")
</pallas_src>

<mosaic_0001>
module attributes {stable_mosaic.version = 11 : i64} {
  func.func @_l2pool_kernel(%arg0: i32, %arg1: memref<64x16xf32, #tpu.memory_space<vmem>>, %arg2: memref<16x8xf32, #tpu.memory_space<vmem>>, %arg3: memref<32x1xf32, #tpu.memory_space<vmem>>, %arg4: memref<32x8xf32, #tpu.memory_space<vmem>>) attributes {dimension_semantics = [#tpu.dimension_semantics<parallel>], iteration_bounds = array<i64: 2>, scalar_prefetch = 0 : i64, scratch_operands = 0 : i64, tpu.core_type = #tpu.core_type<tc>, window_params = [{transform_indices = @transform_0, window_bounds = array<i64: 64, 16>}, {pipeline_mode = #tpu.pipeline_mode<synchronous>, transform_indices = @transform_1, window_bounds = array<i64: 16, 8>}, {pipeline_mode = #tpu.pipeline_mode<synchronous>, transform_indices = @transform_2, window_bounds = array<i64: 32, 1>}, {transform_indices = @transform_3, window_bounds = array<i64: 32, 8>}]} {
    %c0 = arith.constant 0 : index
    %c0_0 = arith.constant 0 : index
    %0 = tpu.strided_load %arg1[%c0, %c0_0] {strides = array<i32: 2, 1>} : memref<64x16xf32, #tpu.memory_space<vmem>>, vector<32x16xf32>
    %c1 = arith.constant 1 : index
    %c0_1 = arith.constant 0 : index
    %1 = tpu.strided_load %arg1[%c1, %c0_1] {strides = array<i32: 2, 1>} : memref<64x16xf32, #tpu.memory_space<vmem>>, vector<32x16xf32>
    %2 = arith.mulf %0, %0 : vector<32x16xf32>
    %3 = arith.mulf %1, %1 : vector<32x16xf32>
    %cst = arith.constant 0.000000e+00 : f32
    %4 = vector.broadcast %cst : f32 to vector<1x16xf32>
    %5 = vector.extract_strided_slice %3 {offsets = [0, 0], sizes = [31, 16], strides = [1, 1]} : vector<32x16xf32> to vector<31x16xf32>
    %6 = tpu.concatenate %4, %5 in 0 : vector<1x16xf32>, vector<31x16xf32> -> vector<32x16xf32>
    %c0_2 = arith.constant 0 : index
    %c0_3 = arith.constant 0 : index
    %7 = vector.load %arg3[%c0_2, %c0_3] : memref<32x1xf32, #tpu.memory_space<vmem>>, vector<32x1xf32>
    %8 = vector.broadcast %7 : vector<32x1xf32> to vector<32x16xf32>
    %9 = arith.mulf %6, %8 : vector<32x16xf32>
    %cst_4 = arith.constant 2.000000e+00 : f32
    %10 = vector.broadcast %cst_4 : f32 to vector<32x16xf32>
    %11 = arith.mulf %10, %2 : vector<32x16xf32>
    %12 = arith.addf %9, %11 : vector<32x16xf32>
    %13 = arith.addf %12, %3 : vector<32x16xf32>
    %c0_5 = arith.constant 0 : index
    %c0_6 = arith.constant 0 : index
    %14 = vector.load %arg2[%c0_5, %c0_6] : memref<16x8xf32, #tpu.memory_space<vmem>>, vector<16x8xf32>
    %cst_7 = arith.constant dense<0.000000e+00> : vector<32x8xf32>
    %15 = tpu.matmul %13, %14, %cst_7 {dimension_numbers = #tpu.dot_dimension_numbers<[1], [0], [0], [1], [0, 0, 1, 1], [], []>, precision = #tpu.contract_precision<fp32>} : vector<32x16xf32>, vector<16x8xf32>, vector<32x8xf32> -> vector<32x8xf32>
    %cst_8 = arith.constant 9.99999996E-13 : f32
    %16 = vector.broadcast %cst_8 : f32 to vector<32x8xf32>
    %17 = arith.addf %15, %16 : vector<32x8xf32>
    %18 = math.sqrt %17 : vector<32x8xf32>
    %c0_9 = arith.constant 0 : index
    %c0_10 = arith.constant 0 : index
    %19 = vector.load %arg4[%c0_9, %c0_10] : memref<32x8xf32, #tpu.memory_space<vmem>>, vector<32x8xf32>
    tpu.vector_store %arg4[%c0_9, %c0_10], %18 {strides = array<i32>} : memref<32x8xf32, #tpu.memory_space<vmem>>, vector<32x8xf32>,
    return
  }
  func.func @transform_0(%arg0: i32) -> (i32, i32) {
    %c0_i32 = arith.constant 0 : i32
    %c0_i32_0 = arith.constant 0 : i32
    return %arg0, %c0_i32 : i32, i32
  }
  func.func @transform_1(%arg0: i32) -> (i32, i32) {
    %c0_i32 = arith.constant 0 : i32
    %c0_i32_0 = arith.constant 0 : i32
    %c0_i32_1 = arith.constant 0 : i32
    return %c0_i32, %c0_i32_0 : i32, i32
  }
  func.func @transform_2(%arg0: i32) -> (i32, i32) {
    %c0_i32 = arith.constant 0 : i32
    %c0_i32_0 = arith.constant 0 : i32
    %c0_i32_1 = arith.constant 0 : i32
    return %c0_i32, %c0_i32_0 : i32, i32
  }
  func.func @transform_3(%arg0: i32) -> (i32, i32) {
    %c0_i32 = arith.constant 0 : i32
    %c0_i32_0 = arith.constant 0 : i32
    return %arg0, %c0_i32 : i32, i32
  }
}

</mosaic_0001>

<bundles_post_ra>
// kernel: l2pool2d.1
= control target key start
LH: loop header
LB: loop body
LE: loop exit
PB: predicated region body
PF: predicated region fallthrough
CT: control target
= control target key end

     0   :  { %8 = vsyncpa [#allocation3], 0  ;;  %s1768_s0 = inlined_call_operand.hbm [shape: f32[128,16], index: 0, kind: input, shape index: {}]   ;;  %s1769_s1 = inlined_call_operand.hbm [shape: f32[16,8], index: 1, kind: input, shape index: {}]   ;;  %s1770_s2 = inlined_call_operand.hbm [shape: f32[32,1], index: 2, kind: input, shape index: {}]   ;;  %s1771_s3 = inlined_call_operand.hbm [shape: f32[64,8], index: 3, kind: output, shape index: {}]  }
   0x1   :  { %10 = vsyncpa [#allocation3 + $0x1], 0 }
   0x2   :  { %11 = vsyncpa [#allocation6], 0 }
   0x3   :  { %12 = vsyncpa [#allocation4], 0 }
   0x4   :  { %14 = vsyncpa [#allocation4 + $0x1], 0  ;;  %s1482_s12 = smov 0   ;;  %s1484_s13 = smov 0  }
   0x5   :  { %s1486_s14 = smov 0   ;;  %s1488_s15 = smov 0  }
   0x6 LB: > { %s1503_s16 = sadd.s32 4294967295, %s1451_s15   ;;  %s1042_s17 = sadd.s32 4294967294, %s1451_s15   ;;  %s1451_s15 = sphi %s1488_s15, %s1791_s15   ;;  %s1447_s14 = sphi %s1486_s14, %s1790_s14   ;;  %s1443_s13 = sphi %s1484_s13, %s1789_s13   ;;  %s1439_s12 = sphi %s1482_s12, %s1788_s12  }
   0x7   : > { %p40_p0 = scmp.ne.s32.totalorder %s1443_s13, %s1439_s12  ;;  %p1772_p1 = scmp.eq.s32.totalorder %s1503_s16, 0 }
   0x8   : > { %p112_p3 = scmp.eq.s32.totalorder %s1042_s17, 1  ;;  %p1043_p5 = scmp.ge.s32.totalorder %s1451_s15, 1 }
   0x9   : > { %p1512_p4 = por %p1772_p1, %p40_p0  ;;  %p119_p7 = scmp.lt.s32.totalorder %s1451_s15, 3 }
   0xa   : > { %p1517_p6 = por %p112_p3, %p40_p0  ;;  %s1453_s21 = smov [#allocation5]  }
   0xb   : > { %s1775_s18 = scalar_select %p1512_p4, 1, 0 }
   0xc   : > { %s1776_s19 = scalar_select %p1517_p6, 1, 0 }
   0xd   : > { %p1522_p8 = pnand %p1043_p5, %p119_p7  ;;  %s131_s22 = sshll.u32 %s1453_s21, 4  ;;  %s1526_s22 = int_to_ptr.vmem [resolvable:$true] %s131_s22 }
   0xe   : > { %s1454_s24 = smov [#allocation7]   ;;  %s1295_s28 = scalar_lea.hbm %s1769_s1, 256 }
   0xf   : > { %p1225_p9 = pneg %p1522_p8  ;;  %s144_s25 = sshll.u32 %s1454_s24, 4  ;;  %s1537_s25 = int_to_ptr.vmem [resolvable:$true] %s144_s25 }
  0x10   : > { %p1296_p12 = scmp.ne.s32.totalorder %s1769_s1, %s1295_s28  ;;  %p1302_p5 = scmp.lt.u32.totalorder %s1295_s28, %s1769_s1 }
  0x11   : > { %p1533_p11 = pnand %p1225_p9, %p1772_p1 }
  0x13   : > { %p1297_p13 = pneg %p1533_p11 }
  0x15   : > { %p1298_p0 = pnand %p1297_p13, %p1296_p12 }
  0x17   : > { %p1299_p3 = pneg %p1298_p0 }
  0x19   : > { %p1304_p7 = pnand %p1302_p5, %p1299_p3 }
  0x1b   : > { %1307 = shalt.err (!%p1304_p7)
}
  0x1c   : > { %s1308_s6 = scalar_lea.vmem %s1526_s22, 256  ;;  %p1316_p2 = scmp.lt.s32.totalorder %s1526_s22, %s1526_s22 }
  0x1d   : > { %p1309_p9 = scmp.ne.s32.totalorder %s1526_s22, %s1308_s6  ;;  %p1317_p12 = scmp.lt.s32.totalorder %s1308_s6, %s1308_s6 }
  0x1f   : > { %p1311_p10 = pnand %p1309_p9, %p1297_p13  ;;  %p1318_p0 = por %p1317_p12, %p1316_p2 }
  0x21   : > { %p1312_p1 = pneg %p1311_p10 }
  0x23   : > { %p1319_p6 = pnand %p1318_p0, %p1312_p1 }
  0x25   : > { %1322 = shalt.err (!%p1319_p6)
}
  0x26   : > { %s1455_s7 = smov 128   ;;  %s1456_s8 = smov 8  }
  0x27   : > { %1228 = dma.hbm_to_vmem [thread:$0]  (!%p1533_p11), %s1769_s1, 256, %s1526_s22, [#allocation6], %s1455_s7, %s1455_s7, %s1456_s8  }
  0x28   : > { %s1323_s21 = scalar_lea.hbm %s1770_s2, 512 }
  0x29   : > { %p1324_p1 = scmp.ne.s32.totalorder %s1770_s2, %s1323_s21  ;;  %p1330_p10 = scmp.lt.u32.totalorder %s1323_s21, %s1770_s2 }
  0x2b   : > { %p1326_p2 = pnand %p1324_p1, %p1297_p13 }
  0x2d   : > { %p1327_p6 = pneg %p1326_p2 }
  0x2f   : > { %p1332_p3 = pnand %p1330_p10, %p1327_p6 }
  0x31   : > { %1335 = shalt.err (!%p1332_p3)
}
  0x32   : > { %s1336_s22 = scalar_lea.vmem %s1537_s25, 512  ;;  %p1344_p12 = scmp.lt.s32.totalorder %s1537_s25, %s1537_s25 }
  0x33   : > { %p1337_p5 = scmp.ne.s32.totalorder %s1537_s25, %s1336_s22  ;;  %p1345_p0 = scmp.lt.s32.totalorder %s1336_s22, %s1336_s22 }
  0x35   : > { %p1339_p7 = pnand %p1337_p5, %p1297_p13  ;;  %p1346_p1 = por %p1345_p0, %p1344_p12 }
  0x37   : > { %p1340_p9 = pneg %p1339_p7 }
  0x39   : > { %p1347_p2 = pnand %p1346_p1, %p1340_p9 }
  0x3b   : > { %1350 = shalt.err (!%p1347_p2)
}
  0x3c   : > { %1231 = dma.hbm_to_vmem [thread:$0]  (!%p1533_p11), %s1770_s2, 512, %s1537_s25, [#allocation6], %s1455_s7, %s1455_s7, %s1456_s8  }
  0x3d   : > { %s1598_s23 = sadd.s32 1, %s1451_s15   ;;  %s27_s4 = sadd.s32 1, %s1447_s14 }
  0x3e   : > { %s24_s5 = ssub.s32 %s1451_s15, %s1598_s23  ;;  %p34_p13 = scmp.ne.s32.totalorder %s1447_s14, %s1443_s13 }
  0x3f   : > { %p25_p6 = scmp.eq.s32.totalorder %s24_s5, 0  ;;  %p35_p10 = scmp.eq.s32.totalorder %s1451_s15, 0 }
  0x40   : > { %p1779_p3 = scmp.eq.s32.totalorder %s1503_s16, 1  ;;  %p1242_p7 = scmp.lt.s32.totalorder %s1451_s15, 2 }
  0x41   : > { %s1614_s9 = scalar_select %p25_p6, %s1447_s14, %s27_s4  }
  0x42   : > { %p1608_p5 = por %p1779_p3, %p34_p13  ;;  %p36_p9 = por %p35_p10, %p34_p13 }
  0x43   : > { %s158_s10 = sand.u32 1, %s1447_s14   ;;  %s1067_s25 = sshll.u32 %s1451_s15, 10 }
  0x44   : > { %s1780_s6 = scalar_select %p1608_p5, 1, 0 }
  0x45   : > { %s1047_s11 = sshll.u32 %s158_s10, 6  ;;  %s1621_s24 = scalar_lea.hbm %s1768_s0, %s1067_s25 }
  0x46   : > { %s162_s26 = scalar_lea.vmem [#allocation2], %s1047_s11  ;;  %p1625_p11 = pnand %p1242_p7, %p36_p9 }
  0x47   : > { %s169_s27 = sshll.u32 %s162_s26, 4  ;;  %s1629_s22 = scalar_lea.sflag [#allocation3], %s158_s10  ;;  %s1623_s27 = int_to_ptr.vmem [resolvable:$true] %s169_s27 }
  0x48   : > { %s1351_s29 = scalar_lea.hbm %s1621_s24, 1024  ;;  %p1353_p0 = pneg %p1625_p11 }
  0x49   : > { %p1352_p12 = scmp.ne.s32.totalorder %s1621_s24, %s1351_s29  ;;  %s1356_s5 = scalar_lea.hbm %s1768_s0, 2048 }
  0x4a   : > { %p1357_p13 = scmp.lt.u32.totalorder %s1621_s24, %s1768_s0  ;;  %p1358_p6 = scmp.lt.u32.totalorder %s1356_s5, %s1351_s29 }
  0x4b   : > { %p1354_p1 = pnand %p1353_p0, %p1352_p12  ;;  %p1360_p3 = scmp.lt.u32.totalorder %s1351_s29, %s1621_s24 }
  0x4c   : > { %p1359_p10 = por %p1358_p6, %p1357_p13 }
  0x4d   : > { %p1355_p2 = pneg %p1354_p1 }
  0x4e   : > { %p1361_p7 = por %p1360_p3, %p1359_p10 }
  0x50   : > { %p1362_p9 = pnand %p1361_p7, %p1355_p2 }
  0x52   : > { %1365 = shalt.err (!%p1362_p9)
}
  0x53   : > { %s1366_s10 = scalar_lea.vmem %s1623_s27, 1024  ;;  %s1457_s17 = smov [#allocation2]  }
  0x54   : > { %p1367_p12 = scmp.ne.s32.totalorder %s1623_s27, %s1366_s10  ;;  %s1371_s21 = sshll.u32 %s1457_s17, 4  ;;  %s1372_s21 = int_to_ptr.vmem [resolvable:$false] %s1371_s21 }
  0x55   : > { %s1373_s26 = scalar_lea.vmem %s1372_s21, 2048  ;;  %p1374_p4 = scmp.lt.s32.totalorder %s1623_s27, %s1372_s21 }
  0x56   : > { %p1369_p1 = pnand %p1367_p12, %p1353_p0  ;;  %p1375_p13 = scmp.lt.s32.totalorder %s1373_s26, %s1366_s10 }
  0x58   : > { %p1370_p5 = pneg %p1369_p1  ;;  %p1376_p6 = por %p1375_p13, %p1374_p4 }
  0x5a   : > { %p1377_p10 = pnand %p1376_p6, %p1370_p5 }
  0x5c   : > { %1380 = shalt.err (!%p1377_p10)
}
  0x5d   : > { %1235 = dma.hbm_to_vmem [thread:$0]  (!%p1625_p11), %s1621_s24, 1024, %s1623_s27, %s1629_s22, %s1455_s7, %s1455_s7, %s1456_s8  }
  0x5e   : > { %181 = sbr.rel (%p1522_p8) target bundleno = 523 (0x20b), region = 32  ;;  %s1663_s29 = sand.u32 (!%p1522_p8), 1, %s1443_s13  }
  0x5f   : > { %s1051_s30 = sshll.u32 (!%p1522_p8), %s1663_s29, 6  ;;  %s184_s4 = scalar_lea.sflag (!%p1522_p8), [#allocation3], %s1663_s29 }
  0x60   : > { %s1667_s5 = scalar_lea.vmem (!%p1522_p8), [#allocation2], %s1051_s30  ;;  %p1782_p4 = scmp.ne.s32.totalorder (!%p1522_p8), %s1775_s18, 0 }
  0x65   : > { %1426 = dma.done.wait (%p1782_p4), %s184_s4, 1024  }
  0x66   : > { %1428 = vsyncadd (%p1782_p4), %s184_s4, 4294966272  ;;  %p1783_p5 = scmp.eq.s32.totalorder %s1503_s16, 0 }
  0x68   : > { %1430 = dma.done.wait (%p1783_p5), [#allocation6], 768   ;;  %p1784_p8 = pmov %p1783_p5 }
  0x69   : > { %v1458_v0 = vmov 0   ;;  %v262_v1 = vld [vmem:[#allocation7 + $0x10] sm:$0xff]  ;;  %v260_v2 = vld [vmem:[#allocation7] sm:$0xff]  ;;  %v263_v3 = vld [vmem:[#allocation7 + $0x18] sm:$0xff]  ;;  %vm247_vm0 = vcmask 1040384   ;;  %vm302_vm1 = vcmask 130048  }
  0x6a   : > { %1432 = vsyncadd (%p1784_p8), [#allocation6], 4294966528  ;;  %1286 = vset.pattern.permute.xlu1 %v1458_v0  ;;  %1285 = vset.pattern.permute.xlu0 %v1458_v0  ;;  %v261_v4 = vld [vmem:[#allocation7 + $0x8] sm:$0xff]  ;;  %v300_v5 = vld [vmem:[#allocation5] sm:$0xff]  ;;  %s1054_s18 = sshll.u32 %s1663_s29, 5  ;;  %vm931_vm3 = vcmask 64512  }
  0x6b   : > { %276 = vperm.xlu1 %1286, %v262_v1   ;;  %266 = vperm.xlu0 %1285, %v260_v2   ;;  %v301_v6 = vld [vmem:[#allocation5 + $0x8] sm:$0xff]  ;;  %v316_v7 = vand.u32 4294901760, %v300_v5  ;;  %v1059_v21 = vld [vmem:[%s1667_s5 + $0x11] ss:$2 sm:$0xff]  ;;  %v1057_v36 = vld [vmem:[%s1667_s5 + $0x30] ss:$2 sm:$0xff] }
  0x6c   : > { %v319_v8 = vand.u32 4294901760, %v301_v6  ;;  %v1060_v22 = vld [vmem:[%s1667_s5 + $0x21] ss:$2 sm:$0xff]  ;;  %v240_v24 = vmul.f32 %v1059_v21, %v1059_v21  ;;  %v1061_v27 = vld [vmem:[%s1667_s5 + $0x31] ss:$2 sm:$0xff]  ;;  %v238_v43 = vmul.f32 %v1057_v36, %v1057_v36  ;;  %s217_s20 = scalar_lea.vmem [#allocation8], %s1054_s18 }
  0x6d   : > { %v424_v10 = vsub.f32 %v300_v5, %v316_v7  ;;  %v1058_v23 = vld [vmem:[%s1667_s5 + $0x1] ss:$2 sm:$0xff]  ;;  %v241_v25 = vmul.f32 %v1060_v22, %v1060_v22  ;;  %v1056_v28 = vld [vmem:[%s1667_s5 + $0x20] ss:$2 sm:$0xff]  ;;  %v242_v33 = vmul.f32 %v1061_v27, %v1061_v27  ;;  %v1055_v37 = vld [vmem:[%s1667_s5 + $0x10] ss:$2 sm:$0xff] }
  0x6e   : > { %v1677_v9 = vpack.c.bf16 %v319_v8, %v316_v7  ;;  %v431_v11 = vsub.f32 %v301_v6, %v319_v8  ;;  %v239_v26 = vmul.f32 %v1058_v23, %v1058_v23  ;;  %v220_v29 = vld [vmem:[%s1667_s5] ss:$2 sm:$0xff]  ;;  %v249_v30 = vrot.slane %v240_v24, 7  ;;  %s1068_s7 = sshll.u32 %s1503_s16, 9  ;;  %s950_s8 = sshll.u32 %s217_s20, 4  ;;  %s1722_s8 = int_to_ptr.vmem [resolvable:$true] %s950_s8 }
  0x6f   : > { %281 = vperm.xlu1 %1286, %v263_v3   ;;  %271 = vperm.xlu0 %1285, %v261_v4   ;;  %v425_v12 = vand.u32 4294901760, %v424_v10  ;;  %v251_v31 = vrot.slane %v241_v25, 7  ;;  %v237_v34 = vmul.f32 %v1056_v28, %v1056_v28  ;;  %v235_v35 = vmul.f32 %v220_v29, %v220_v29  ;;  %s1720_s28 = scalar_lea.hbm %s1771_s3, %s1068_s7  ;;  %s937_s16 = scalar_lea.sflag [#allocation4], %s1663_s29 }
  0x70   : > { %1178 = vmatprep.subr.bf16.mxu0 %v1677_v9  ;;  %1166 = vmatprep.subr.bf16.mxu1 %v1677_v9  ;;  %v432_v13 = vand.u32 4294901760, %v431_v11  ;;  %v1689_v20 = vpack.c.bf16 %v431_v11, %v424_v10  ;;  %v248_v32 = vrot.slane %v239_v26, 7  ;;  %v253_v40 = vrot.slane %v242_v33, 7  ;;  %s1381_s22 = scalar_lea.vmem %s1722_s8, 512  ;;  %p1785_p0 = scmp.ne.s32.totalorder %s1780_s6, 0 }
  0x71   : > { %1180 = vmatpush3.bf16.msra.mxu0 %v1677_v9  ;;  %1168 = vmatpush3.bf16.msra.mxu1 %v1677_v9  ;;  %v426_v14 = vsub.f32 %v424_v10, %v425_v12  ;;  %v252_v38 = vsel %vm247_vm0, %v249_v30, %v251_v31  ;;  %v290_v41 = vmul.f32 2.0, %v237_v34  ;;  %v288_v42 = vmul.f32 2.0, %v235_v35  ;;  %p1382_p11 = scmp.ne.s32.totalorder %s1722_s8, %s1381_s22  ;;  %s1459_s11 = smov [#allocation8]  }
  0x72   : > { %v433_v15 = vsub.f32 %v431_v11, %v432_v13  ;;  %v1683_v16 = vpack.c.bf16 %v432_v13, %v425_v12  ;;  %v259_v39 = vsel %vm247_vm0, 0.0, %v248_v32  ;;  %v236_v44 = vmul.f32 %v1055_v37, %v1055_v37  ;;  %s1385_s25 = sshll.u32 %s1459_s11, 4  ;;  %s1386_s25 = int_to_ptr.vmem [resolvable:$false] %s1385_s25 }
  0x73   : > { %v427_v17 = vand.u32 4294901760, %v426_v14  ;;  %v254_v49 = vsel %vm247_vm0, %v251_v31, %v253_v40  ;;  %v250_v50 = vsel %vm247_vm0, %v248_v32, %v249_v30  ;;  %v291_v53 = vmul.f32 2.0, %v238_v43  ;;  %p1383_p2 = pnand %p1382_p11, %p1785_p0  ;;  %s1387_s10 = scalar_lea.vmem %s1386_s25, 1024 }
  0x74   : > { %v434_v18 = vand.u32 4294901760, %v433_v15  ;;  %1182 = vmatprep.subr.bf16.mxu0 %v1683_v16  ;;  %v289_v54 = vmul.f32 2.0, %v236_v44  ;;  %p1388_p7 = scmp.lt.s32.totalorder %s1722_s8, %s1386_s25  ;;  %p1389_p9 = scmp.lt.s32.totalorder %s1387_s10, %s1381_s22 }
  0x75   : > { %p1384_p3 = pneg %p1383_p2 }
  0x76   : > { %v1686_v19 = vpack.c.bf16 %v434_v18, %v427_v17  ;;  %p1390_p12 = por %p1389_p9, %p1388_p7 }
  0x78   : > { %1170 = vmatprep.subr.bf16.mxu1 %v1686_v19  ;;  %p1391_p1 = pnand %p1390_p12, %p1384_p3 }
  0xea   : > { %v277_v45 = vpop.permute.xlu1 %276  ;;  %v267_v46 = vpop.permute.xlu0 %266 }
  0xeb   : > { %v286_v47 = vmul.f32 %v277_v45, %v252_v38  ;;  %v284_v48 = vmul.f32 %v267_v46, %v259_v39 }
  0xed   : > { %v294_v51 = vadd.f32 %v290_v41, %v286_v47  ;;  %v292_v52 = vadd.f32 %v288_v42, %v284_v48 }
  0xee   : > { %v282_v55 = vpop.permute.xlu1 %281  ;;  %v272_v56 = vpop.permute.xlu0 %271 }
  0xef   : > { %v298_v57 = vadd.f32 %v294_v51, %v241_v25  ;;  %v296_v58 = vadd.f32 %v292_v52, %v239_v26  ;;  %v287_v59 = vmul.f32 %v282_v55, %v254_v49  ;;  %v285_v60 = vmul.f32 %v272_v56, %v250_v50 }
  0xf1   : > { %v310_v61 = vsel %vm302_vm1, %v298_v57, 0  ;;  %v304_v62 = vsel %vm302_vm1, %v296_v58, 0  ;;  %v295_v63 = vadd.f32 %v291_v53, %v287_v59  ;;  %v293_v0 = vadd.f32 %v289_v54, %v285_v60 }
  0xf2   : > { %v402_v1 = vand.u32 4294901760, %v310_v61  ;;  %v382_v2 = vand.u32 4294901760, %v304_v62 }
  0xf3   : > { %v299_v3 = vadd.f32 %v295_v63, %v242_v33  ;;  %v297_v4 = vadd.f32 %v293_v0, %v240_v24 }
  0xf4   : > { %v403_v5 = vsub.f32 %v310_v61, %v402_v1  ;;  %v383_v6 = vsub.f32 %v304_v62, %v382_v2 }
  0xf5   : > { %v313_v7 = vsel %vm302_vm1, %v299_v3, 0  ;;  %v307_v8 = vsel %vm302_vm1, %v297_v4, 0 }
  0xf6   : > { %v412_v10 = vand.u32 4294901760, %v313_v7  ;;  %v392_v11 = vand.u32 4294901760, %v307_v8  ;;  %v384_v12 = vand.u32 4294901760, %v383_v6  ;;  %v404_v13 = vand.u32 4294901760, %v403_v5 }
  0xf8   : > { %v413_v14 = vsub.f32 %v313_v7, %v412_v10  ;;  %v393_v15 = vsub.f32 %v307_v8, %v392_v11  ;;  %1139 = vmatprep.mubr.f32.mxu0 %v384_v12  ;;  %v385_v17 = vsub.f32 %v383_v6, %v384_v12  ;;  %v405_v23 = vsub.f32 %v403_v5, %v404_v13 }
  0xfa   : > { %v386_v18 = vand.u32 4294901760, %v385_v17  ;;  %v394_v21 = vand.u32 4294901760, %v393_v15  ;;  %v414_v22 = vand.u32 4294901760, %v413_v14  ;;  %v406_v27 = vand.u32 4294901760, %v405_v23 }
  0xfc   : > { %1109 = vmatprep.mubr.f32.mxu1 %v386_v18  ;;  %1140 = vmatmul.mubr.f32.vlgmr.msra.gmra.mrb[0].mxu0 %v394_v21  ;;  %v395_v24 = vsub.f32 %v393_v15, %v394_v21  ;;  %v415_v26 = vsub.f32 %v413_v14, %v414_v22 }
  0xfd   : > { %1142 = vmatprep.mubr.f32.mxu0 %v404_v13  ;;  %1184 = vmatpush3.bf16.msra.mxu0 %v1683_v16 }
  0xfe   : > { %v396_v25 = vand.u32 4294901760, %v395_v24  ;;  %1186 = vmatprep.subr.bf16.mxu0 %v1677_v9  ;;  %v416_v28 = vand.u32 4294901760, %v415_v26 }
 0x100   : > { %1110 = vmatmul.mubr.f32.vlgmr.msra.gmra.mrb[0].mxu1 %v396_v25  ;;  %1143 = vmatmul.mubr.f32.gmra.mrb[2].mxu0 %v414_v22 }
 0x101   : > { %1172 = vmatpush3.bf16.msra.mxu1 %v1686_v19  ;;  %1112 = vmatprep.mubr.f32.mxu1 %v406_v27 }
 0x102   : > { %1149 = vmatprep.mubr.f32.mxu0 %v382_v2  ;;  %1174 = vmatprep.subr.bf16.mxu1 %v1689_v20 }
 0x104   : > { %1113 = vmatmul.mubr.f32.gmra.mrb[2].mxu1 %v416_v28  ;;  %1150 = vmatmul.mubr.f32.vlgmr.msra.gmra.mrb[0].mxu0 %v392_v11 }
 0x105   : > { %1119 = vmatprep.mubr.f32.mxu1 %v382_v2  ;;  %1152 = vmatprep.mubr.f32.mxu0 %v402_v1 }
 0x106   : > { %1188 = vmatpush3.bf16.msra.mxu0 %v1677_v9 }
 0x108   : > { %1120 = vmatmul.mubr.f32.vlgmr.msra.gmra.mrb[0].mxu1 %v392_v11  ;;  %1153 = vmatmul.mubr.f32.gmra.mrb[2].mxu0 %v412_v10 }
 0x109   : > { %1176 = vmatpush3.bf16.msra.mxu1 %v1689_v20  ;;  %1122 = vmatprep.mubr.f32.mxu1 %v402_v1 }
 0x10a   : > { %1159 = vmatprep.mubr.f32.mxu0 %v382_v2 }
 0x10c   : > { %1123 = vmatmul.mubr.f32.gmra.mrb[2].mxu1 %v412_v10  ;;  %1160 = vmatmul.mubr.f32.vlgmr.msra.gmra.mrb[0].mxu0 %v392_v11 }
 0x10d   : > { %1129 = vmatprep.mubr.f32.mxu1 %v383_v6  ;;  %1162 = vmatprep.mubr.f32.mxu0 %v402_v1 }
 0x110   : > { %1130 = vmatmul.mubr.f32.vlgmr.msra.gmra.mrb[0].mxu1 %v393_v15  ;;  %1163 = vmatmul.mubr.f32.gmra.mrb[2].mxu0 %v412_v10 }
 0x111   : > { %1132 = vmatprep.mubr.f32.mxu1 %v403_v5 }
 0x114   : > { %1133 = vmatmul.mubr.f32.gmra.mrb[2].mxu1 %v413_v14 }
 0x1df   : > { %v1161_v16 = vpop.f32.mrb[0].mxu0 }
 0x1e0   : > { %v881_v19 = vpop.f32.mrb[1].mxu0 }
 0x1e3   : > { %v1131_v29 = vpop.f32.mrb[0].mxu1  ;;  %v1164_v30 = vpop.f32.mrb[2].mxu0 }
 0x1e4   : > { %v1189_v31 = vadd.f32 1e-12, %v1131_v29  ;;  %v593_v9 = vpop.f32.mrb[1].mxu1  ;;  %v893_v32 = vpop.f32.mrb[3].mxu0 }
 0x1e5   : > { %v1191_v33 = vadd.f32 1e-12, %v593_v9 }
 0x1e6   : > { %v1190_v20 = vadd.f32 %v1189_v31, %v1161_v16 }
 0x1e7   : > { %v1192_v34 = vadd.f32 %v1191_v33, %v881_v19  ;;  %v1134_v35 = vpop.f32.mrb[2].mxu1 }
 0x1e8   : > { %1287 = vrsqrt.f32 %v1190_v20  ;;  %v607_v36 = vpop.f32.mrb[3].mxu1  ;;  %v1193_v37 = vadd.f32 1e-12, %v1134_v35  ;;  %vm912_vm2 = vcmp.eq.f32.partialorder %v1190_v20, inf  ;;  %v915_v44 = vand.u32 2147483648, %v1190_v20 }
 0x1e9   : > { %1289 = vrsqrt.f32 %v1192_v34  ;;  %v1195_v38 = vadd.f32 1e-12, %v607_v36  ;;  %vm914_vm4 = vcmp.eq.f32.partialorder %v1190_v20, 0.0  ;;  %vm905_vm5 = vcmp.eq.f32.partialorder %v1192_v34, inf }
 0x1ea   : > { %v1194_v39 = vadd.f32 %v1193_v37, %v1164_v30  ;;  %v908_v47 = vand.u32 2147483648, %v1192_v34  ;;  %vm907_vm6 = vcmp.eq.f32.partialorder %v1192_v34, 0.0 }
 0x1eb   : > { %v1196_v40 = vadd.f32 %v1195_v38, %v893_v32 }
 0x1ec   : > { %1291 = vrsqrt.f32 %v1194_v39  ;;  %vm926_vm7 = vcmp.eq.f32.partialorder %v1194_v39, inf  ;;  %v929_v54 = vand.u32 2147483648, %v1194_v39  ;;  %vm928_vm8 = vcmp.eq.f32.partialorder %v1194_v39, 0.0 }
 0x1ed   : > { %1293 = vrsqrt.f32 %v1196_v40  ;;  %vm919_vm9 = vcmp.eq.f32.partialorder %v1196_v40, inf  ;;  %v922_v57 = vand.u32 2147483648, %v1196_v40  ;;  %vm921_vm10 = vcmp.eq.f32.partialorder %v1196_v40, 0.0 }
 0x1f2   : > { %v1288_v41 = vpop.eup %1287 }
 0x1f3   : > { %v1290_v42 = vpop.eup %1289  ;;  %v911_v43 = vmul.f32 %v1288_v41, %v1190_v20 }
 0x1f4   : > { %v904_v45 = vmul.f32 %v1290_v42, %v1192_v34 }
 0x1f5   : > { %v913_v46 = vsel %vm912_vm2, %v1190_v20, %v911_v43 }
 0x1f6   : > { %v916_v48 = vsel %vm914_vm4, %v915_v44, %v913_v46  ;;  %v906_v49 = vsel %vm905_vm5, %v1192_v34, %v904_v45  ;;  %v1292_v51 = vpop.eup %1291 }
 0x1f7   : > { %v909_v50 = vsel %vm907_vm6, %v908_v47, %v906_v49  ;;  %933 = vst.msk [vmem:[%s217_s20 + $0x8] sm:$0xff] %vm931_vm3, %v916_v48  ;;  %v1294_v52 = vpop.eup %1293  ;;  %v925_v53 = vmul.f32 %v1292_v51, %v1194_v39 }
 0x1f8   : > { %932 = vst.msk [vmem:[%s217_s20] sm:$0xff] %vm931_vm3, %v909_v50  ;;  %v918_v55 = vmul.f32 %v1294_v52, %v1196_v40 }
 0x1f9   : > { %v927_v56 = vsel %vm926_vm7, %v1194_v39, %v925_v53 }
 0x1fa   : > { %v930_v58 = vsel %vm928_vm8, %v929_v54, %v927_v56  ;;  %v920_v59 = vsel %vm919_vm9, %v1196_v40, %v918_v55 }
 0x1fb   : > { %v923_v60 = vsel %vm921_vm10, %v922_v57, %v920_v59  ;;  %935 = vst.msk [vmem:[%s217_s20 + $0x18] sm:$0xff] %vm931_vm3, %v930_v58 }
 0x1fc   : > { %934 = vst.msk [vmem:[%s217_s20 + $0x10] sm:$0xff] %vm931_vm3, %v923_v60 }
 0x1fd   : > { %1394 = shalt.err (!%p1391_p1)
}
 0x1fe   : > { %s1395_s17 = scalar_lea.hbm %s1720_s28, 512  ;;  %s1399_s30 = scalar_lea.hbm %s1771_s3, 1024 }
 0x1ff   : > { %p1396_p13 = scmp.ne.s32.totalorder %s1720_s28, %s1395_s17  ;;  %p1400_p4 = scmp.lt.u32.totalorder %s1720_s28, %s1771_s3 }
 0x200   : > { %p1401_p5 = scmp.lt.u32.totalorder %s1399_s30, %s1395_s17  ;;  %p1403_p11 = scmp.lt.u32.totalorder %s1395_s17, %s1720_s28 }
 0x201   : > { %p1397_p6 = pnand %p1396_p13, %p1785_p0 }
 0x202   : > { %p1402_p8 = por %p1401_p5, %p1400_p4 }
 0x203   : > { %p1398_p10 = pneg %p1397_p6 }
 0x204   : > { %p1404_p2 = por %p1403_p11, %p1402_p8 }
 0x206   : > { %p1405_p3 = pnand %p1404_p2, %p1398_p10 }
 0x208   : > { %1408 = shalt.err (!%p1405_p3)
}
 0x209   : > { %s1460_s18 = smov 128   ;;  %s1461_s20 = smov 8  }
 0x20a   : > { %1223 = dma.vmem_to_hbm [thread:$0]  (%p1785_p0), %s1722_s8, 512, %s1720_s28, %s937_s16, %s1460_s18, %s1460_s18, %s1461_s20  }
 0x20b PF: > { %s965_s7 = sand.u32 1, %s1439_s12   ;;  %p1786_p7 = scmp.ne.s32.totalorder %s1776_s19, 0 }
 0x20c   : > { %p1787_p9 = scmp.ge.s32.totalorder %s1451_s15, 2  ;;  %s966_s24 = scalar_lea.sflag [#allocation4], %s965_s7 }
 0x20e   : > { %p1237_p12 = pnand %p1787_p9, %p1786_p7 }
 0x210   : > { %1434 = dma.done.wait (!%p1237_p12), %s966_s24, 512  }
 0x211   : > { %1436 = vsyncadd (!%p1237_p12), %s966_s24, 4294966784  ;;  %p17_p1 = scmp.ge.s32.totalorder %s1598_s23, 4   ;;  %s1788_s12 = smov %s1443_s13 }
 0x212   : > { %s1789_s13 = smov %s1447_s14  ;;  %s1790_s14 = smov %s1614_s9 }
 0x213   : > { %s1791_s15 = smov %s1598_s23  ;;  %19 = sbr.rel (!%p17_p1) target bundleno = 6 (0x6), region = 92 }
 0x21a   :  { %971 = vsyncpa [#allocation3], 1 }
 0x21b   :  { %973 = vsyncpa [#allocation3 + $0x1], 1 }
 0x21c   :  { %974 = vsyncpa [#allocation6], 1 }
 0x21d   :  { %975 = vsyncpa [#allocation4], 1 }
 0x21e   :  { %977 = vsyncpa [#allocation4 + $0x1], 1 }

</bundles_post_ra>
